<compile_context>
chip_gen: v7x
topology: tpu7x:2x2x1
jax: 0.10.0
libtpu: 0.0.40
codegen_flags: <defaults>
</compile_context>

<pallas_src>
import numpy as np
import jax
import jax.numpy as jnp
from jax import lax
from jax.experimental import pallas as pl
from jax.experimental.pallas import tpu as pltpu

BN_EPS = 1e-5


def _round_up(x, m):
    return ((x + m - 1) // m) * m


# ----------------------------------------------------------------------------
# Fused kernel factory: conv1 -> bn1 -> relu -> conv2 -> bn2 -> +res -> relu
# All operands are (Cp, Pp) "channels-on-sublane / padded-flat-pixels-on-lane".
# ----------------------------------------------------------------------------
def _make_block_kernel(shifts, pp, n_stat, cp):
    inv_n = 1.0 / float(n_stat)  # BN uses batch stats over the N*H*W valid pixels

    def kernel(x_ref, res_ref, w1_ref, w2_ref,
               g1_ref, b1_ref, g2_ref, b2_ref, mask_ref, out_ref):
        mask = mask_ref[...]                               # (1, Pp) 1.0 at valid pixels

        def conv3x3(src, w):
            # src: (Cp, Pp) zero-padded-image flattened; w: (Cp, 9*Cp)
            # Tap k reads src at flat offset +shift_k  ==  roll by -shift_k.
            taps = jnp.concatenate(
                [src if s == 0 else pltpu.roll(src, shift=(-s) % pp, axis=1)
                 for s in shifts],
                axis=0)                                    # (9*Cp, Pp), sublane-aligned
            return jnp.dot(w, taps, preferred_element_type=jnp.float32)

        def bn_fold(acc, gamma, beta):
            # Training-mode BatchNorm2d, one pass over acc, folded to scale/shift.
            am = acc * mask
            s1 = jnp.sum(am, axis=1, keepdims=True)        # (Cp, 1)
            s2 = jnp.sum(am * acc, axis=1, keepdims=True)  # (Cp, 1)
            mean = s1 * inv_n
            var = s2 * inv_n - mean * mean
            scale = gamma * lax.rsqrt(var + BN_EPS)
            return scale * acc + (beta - scale * mean)

        x = x_ref[...]
        # conv1 -> bn1 -> relu ; re-mask so pad pixels are exact zeros for conv2's taps
        y1 = jnp.maximum(
            bn_fold(conv3x3(x, w1_ref[...]), g1_ref[...], b1_ref[...]), 0.0) * mask
        # conv2 -> bn2 -> + residual -> relu   (y1 never leaves VMEM/vregs)
        y2 = bn_fold(conv3x3(y1, w2_ref[...]), g2_ref[...], b2_ref[...]) + res_ref[...]
        out_ref[...] = jnp.maximum(y2, 0.0)

    return kernel


# ----------------------------------------------------------------------------
# Wrapper: layout conversion (NCHW -> channel-major padded-flat) + pallas_call.
# ----------------------------------------------------------------------------
def basic_block_forward(x_nchw, params):
    N, C, H, W = x_nchw.shape
    c1 = params["conv1_w"].shape[0]       # cfg[1]
    planes = params["conv2_w"].shape[0]

    # channel_selection: indexes are concrete -> resolve at trace time (identity here)
    sel = np.nonzero(np.asarray(params["select_indexes"]))[0]
    if sel.size == 1:
        sel = np.resize(sel, (1,))
    cin = int(sel.size)
    assert params["conv1_w"].shape[1] == cin, "conv1 in-channels must match selection"
    assert planes == C, "identity residual requires planes == inplanes (downsample=None)"

    Hp, Wp = H + 2, W + 2                 # spatially zero-padded (padding=1)
    p_valid = N * Hp * Wp                 # flattened padded pixel count
    PP = _round_up(p_valid, 128)          # lane-dense pixel axis
    CP = _round_up(max(cin, c1, planes), 8)   # sublane-aligned channel axis
    n_stat = N * H * W                    # BN statistics population

    # tap k = dy*3 + dx  ->  flat-pixel shift (dy-1)*Wp + (dx-1)
    shifts = tuple((dy - 1) * Wp + (dx - 1) for dy in range(3) for dx in range(3))

    x_cnhw = jnp.transpose(x_nchw, (1, 0, 2, 3))          # (C, N, H, W)

    def to_flat(x_c):
        # (c, N, H, W) -> pad channels to CP, pad H/W by 1, flatten, pad pixels to PP
        xp = jnp.pad(x_c, ((0, CP - x_c.shape[0]), (0, 0), (1, 1), (1, 1)))
        return jnp.pad(xp.reshape(CP, p_valid), ((0, 0), (0, PP - p_valid)))

    x1 = to_flat(x_cnhw[sel])             # conv1 input (after channel selection)
    res = to_flat(x_cnhw)                 # residual (original x)

    mask = jnp.pad(jnp.ones((1, N, H, W), jnp.float32),
                   ((0, 0), (0, 0), (1, 1), (1, 1)))
    mask = jnp.pad(mask.reshape(1, p_valid), ((0, 0), (0, PP - p_valid)))

    def w_flat(w_oihw):
        # (Co, Ci, 3, 3) -> (CP, 9*CP), column index = (dy*3+dx)*CP + ci
        co, ci = w_oihw.shape[0], w_oihw.shape[1]
        w = jnp.transpose(w_oihw, (0, 2, 3, 1))           # (Co, 3, 3, Ci)
        w = jnp.pad(w, ((0, CP - co), (0, 0), (0, 0), (0, CP - ci)))
        return w.reshape(CP, 9 * CP)

    def vec_pad(v):
        return jnp.pad(v, (0, CP - v.shape[0])).reshape(CP, 1)

    kernel = _make_block_kernel(shifts, PP, n_stat, CP)

    out_flat = pl.pallas_call(
        kernel,
        out_shape=jax.ShapeDtypeStruct((CP, PP), jnp.float32),
        grid=(1,),
        in_specs=[
            pl.BlockSpec((CP, PP), lambda i: (0, 0)),        # x (selected, padded-flat)
            pl.BlockSpec((CP, PP), lambda i: (0, 0)),        # residual
            pl.BlockSpec((CP, 9 * CP), lambda i: (0, 0)),    # w1 (taps-flattened)
            pl.BlockSpec((CP, 9 * CP), lambda i: (0, 0)),    # w2
            pl.BlockSpec((CP, 1), lambda i: (0, 0)),         # bn1 gamma
            pl.BlockSpec((CP, 1), lambda i: (0, 0)),         # bn1 beta
            pl.BlockSpec((CP, 1), lambda i: (0, 0)),         # bn2 gamma
            pl.BlockSpec((CP, 1), lambda i: (0, 0)),         # bn2 beta
            pl.BlockSpec((1, PP), lambda i: (0, 0)),         # valid-pixel mask
        ],
        out_specs=pl.BlockSpec((CP, PP), lambda i: (0, 0)),
        compiler_params=pltpu.CompilerParams(
            dimension_semantics=("arbitrary",)),
    )(x1, res, w_flat(params["conv1_w"]), w_flat(params["conv2_w"]),
      vec_pad(params["bn1_gamma"]), vec_pad(params["bn1_beta"]),
      vec_pad(params["bn2_gamma"]), vec_pad(params["bn2_beta"]), mask)

    # Crop padded channels / padded pixels and return NCHW.
    out = out_flat[:planes, :p_valid].reshape(planes, N, Hp, Wp)[:, :, 1:H + 1, 1:W + 1]
    return jnp.transpose(out, (1, 0, 2, 3))


# ----------------------------------------------------------------------------
# Pure-JAX reference (for correctness check)
# ----------------------------------------------------------------------------
def _bn_train_ref(x_nchw, gamma, beta):
    mean = jnp.mean(x_nchw, axis=(0, 2, 3), keepdims=True)
    var = jnp.mean((x_nchw - mean) ** 2, axis=(0, 2, 3), keepdims=True)
    return (x_nchw - mean) * lax.rsqrt(var + BN_EPS) * gamma.reshape(1, -1, 1, 1) \
        + beta.reshape(1, -1, 1, 1)


def ref_forward(x, params):
    dn = ("NCHW", "OIHW", "NCHW")
    sel = np.nonzero(np.asarray(params["select_indexes"]))[0]
    out = x[:, sel, :, :]
    out = lax.conv_general_dilated(out, params["conv1_w"], (1, 1), "SAME",
                                   dimension_numbers=dn)
    out = jnp.maximum(_bn_train_ref(out, params["bn1_gamma"], params["bn1_beta"]), 0.0)
    out = lax.conv_general_dilated(out, params["conv2_w"], (1, 1), "SAME",
                                   dimension_numbers=dn)
    out = _bn_train_ref(out, params["bn2_gamma"], params["bn2_beta"])
    out = out + x
    return jnp.maximum(out, 0.0)


if __name__ == "__main__":
    # BasicBlock(inplanes=4, planes=4, cfg=[4, 4], stride=1, downsample=None)
    N, inplanes, H, W = 2, 4, 16, 16
    cfg = [4, 4]
    planes = 4

    key = jax.random.PRNGKey(0)
    k_x, k_w1, k_w2, k_g1, k_b1, k_g2, k_b2 = jax.random.split(key, 7)

    params = {
        "select_indexes": np.ones((inplanes,), np.float32),     # all channels kept
        "conv1_w": 0.2 * jax.random.normal(k_w1, (cfg[1], cfg[0], 3, 3), jnp.float32),
        "conv2_w": 0.2 * jax.random.normal(k_w2, (planes, cfg[1], 3, 3), jnp.float32),
        "bn1_gamma": 1.0 + 0.1 * jax.random.normal(k_g1, (cfg[1],), jnp.float32),
        "bn1_beta": 0.1 * jax.random.normal(k_b1, (cfg[1],), jnp.float32),
        "bn2_gamma": 1.0 + 0.1 * jax.random.normal(k_g2, (planes,), jnp.float32),
        "bn2_beta": 0.1 * jax.random.normal(k_b2, (planes,), jnp.float32),
    }

    x = jax.random.normal(k_x, (N, inplanes, H, W), jnp.float32)

    fwd = jax.jit(lambda xx: basic_block_forward(xx, params))
    out = fwd(x)
    jax.block_until_ready(out)

    ref = ref_forward(x, params)
    np.testing.assert_allclose(np.asarray(out), np.asarray(ref), rtol=2e-4, atol=2e-4)

    print("KERNEL_OK")
</pallas_src>

<mosaic_0001>
module attributes {stable_mosaic.version = 11 : i64} {
  func.func @kernel(%arg0: i32, %arg1: memref<8x768xf32, #tpu.memory_space<vmem>>, %arg2: memref<8x768xf32, #tpu.memory_space<vmem>>, %arg3: memref<8x72xf32, #tpu.memory_space<vmem>>, %arg4: memref<8x72xf32, #tpu.memory_space<vmem>>, %arg5: memref<8x1xf32, #tpu.memory_space<vmem>>, %arg6: memref<8x1xf32, #tpu.memory_space<vmem>>, %arg7: memref<8x1xf32, #tpu.memory_space<vmem>>, %arg8: memref<8x1xf32, #tpu.memory_space<vmem>>, %arg9: memref<1x768xf32, #tpu.memory_space<vmem>>, %arg10: memref<8x768xf32, #tpu.memory_space<vmem>>) attributes {dimension_semantics = [#tpu.dimension_semantics<arbitrary>], iteration_bounds = array<i64: 1>, scalar_prefetch = 0 : i64, scratch_operands = 0 : i64, tpu.core_type = #tpu.core_type<tc>, window_params = [{pipeline_mode = #tpu.pipeline_mode<synchronous>, transform_indices = @transform_0, window_bounds = array<i64: 8, 768>}, {pipeline_mode = #tpu.pipeline_mode<synchronous>, transform_indices = @transform_1, window_bounds = array<i64: 8, 768>}, {pipeline_mode = #tpu.pipeline_mode<synchronous>, transform_indices = @transform_2, window_bounds = array<i64: 8, 72>}, {pipeline_mode = #tpu.pipeline_mode<synchronous>, transform_indices = @transform_3, window_bounds = array<i64: 8, 72>}, {pipeline_mode = #tpu.pipeline_mode<synchronous>, transform_indices = @transform_4, window_bounds = array<i64: 8, 1>}, {pipeline_mode = #tpu.pipeline_mode<synchronous>, transform_indices = @transform_5, window_bounds = array<i64: 8, 1>}, {pipeline_mode = #tpu.pipeline_mode<synchronous>, transform_indices = @transform_6, window_bounds = array<i64: 8, 1>}, {pipeline_mode = #tpu.pipeline_mode<synchronous>, transform_indices = @transform_7, window_bounds = array<i64: 8, 1>}, {pipeline_mode = #tpu.pipeline_mode<synchronous>, transform_indices = @transform_8, window_bounds = array<i64: 1, 768>}, {pipeline_mode = #tpu.pipeline_mode<synchronous>, transform_indices = @transform_9, window_bounds = array<i64: 8, 768>}]} {
    %c0 = arith.constant 0 : index
    %c0_0 = arith.constant 0 : index
    %0 = vector.load %arg9[%c0, %c0_0] : memref<1x768xf32, #tpu.memory_space<vmem>>, vector<1x768xf32>
    %c0_1 = arith.constant 0 : index
    %c0_2 = arith.constant 0 : index
    %1 = vector.load %arg1[%c0_1, %c0_2] : memref<8x768xf32, #tpu.memory_space<vmem>>, vector<8x768xf32>
    %c0_3 = arith.constant 0 : index
    %c0_4 = arith.constant 0 : index
    %2 = vector.load %arg3[%c0_3, %c0_4] : memref<8x72xf32, #tpu.memory_space<vmem>>, vector<8x72xf32>
    %c19_i32 = arith.constant 19 : i32
    %3 = tpu.dynamic_rotate %1 by %c19_i32 dim 1 : vector<8x768xf32>, i32 -> vector<8x768xf32>
    %c18_i32 = arith.constant 18 : i32
    %4 = tpu.dynamic_rotate %1 by %c18_i32 dim 1 : vector<8x768xf32>, i32 -> vector<8x768xf32>
    %c17_i32 = arith.constant 17 : i32
    %5 = tpu.dynamic_rotate %1 by %c17_i32 dim 1 : vector<8x768xf32>, i32 -> vector<8x768xf32>
    %c1_i32 = arith.constant 1 : i32
    %6 = tpu.dynamic_rotate %1 by %c1_i32 dim 1 : vector<8x768xf32>, i32 -> vector<8x768xf32>
    %c767_i32 = arith.constant 767 : i32
    %7 = tpu.dynamic_rotate %1 by %c767_i32 dim 1 : vector<8x768xf32>, i32 -> vector<8x768xf32>
    %c751_i32 = arith.constant 751 : i32
    %8 = tpu.dynamic_rotate %1 by %c751_i32 dim 1 : vector<8x768xf32>, i32 -> vector<8x768xf32>
    %c750_i32 = arith.constant 750 : i32
    %9 = tpu.dynamic_rotate %1 by %c750_i32 dim 1 : vector<8x768xf32>, i32 -> vector<8x768xf32>
    %c749_i32 = arith.constant 749 : i32
    %10 = tpu.dynamic_rotate %1 by %c749_i32 dim 1 : vector<8x768xf32>, i32 -> vector<8x768xf32>
    %11 = tpu.concatenate %3, %4, %5, %6, %1, %7, %8, %9, %10 in 0 : vector<8x768xf32>, vector<8x768xf32>, vector<8x768xf32>, vector<8x768xf32>, vector<8x768xf32>, vector<8x768xf32>, vector<8x768xf32>, vector<8x768xf32>, vector<8x768xf32> -> vector<72x768xf32>
    %cst = arith.constant dense<0.000000e+00> : vector<8x768xf32>
    %12 = tpu.matmul %2, %11, %cst {dimension_numbers = #tpu.dot_dimension_numbers<[1], [0], [0], [1], [0, 0, 1, 1], [], []>} : vector<8x72xf32>, vector<72x768xf32>, vector<8x768xf32> -> vector<8x768xf32>
    %c0_5 = arith.constant 0 : index
    %c0_6 = arith.constant 0 : index
    %13 = vector.load %arg5[%c0_5, %c0_6] : memref<8x1xf32, #tpu.memory_space<vmem>>, vector<8x1xf32>
    %c0_7 = arith.constant 0 : index
    %c0_8 = arith.constant 0 : index
    %14 = vector.load %arg6[%c0_7, %c0_8] : memref<8x1xf32, #tpu.memory_space<vmem>>, vector<8x1xf32>
    %15 = vector.broadcast %0 : vector<1x768xf32> to vector<8x768xf32>
    %16 = arith.mulf %12, %15 : vector<8x768xf32>
    %cst_9 = arith.constant dense<0.000000e+00> : vector<8xf32>
    %17 = vector.multi_reduction <add>, %16, %cst_9 [1] : vector<8x768xf32> to vector<8xf32>
    %18 = vector.shape_cast %17 : vector<8xf32> to vector<8x1xf32>
    %19 = arith.mulf %16, %12 : vector<8x768xf32>
    %cst_10 = arith.constant dense<0.000000e+00> : vector<8xf32>
    %20 = vector.multi_reduction <add>, %19, %cst_10 [1] : vector<8x768xf32> to vector<8xf32>
    %21 = vector.shape_cast %20 : vector<8xf32> to vector<8x1xf32>
    %cst_11 = arith.constant 0.001953125 : f32
    %22 = vector.broadcast %cst_11 : f32 to vector<8x1xf32>
    %23 = arith.mulf %18, %22 : vector<8x1xf32>
    %cst_12 = arith.constant 0.001953125 : f32
    %24 = vector.broadcast %cst_12 : f32 to vector<8x1xf32>
    %25 = arith.mulf %21, %24 : vector<8x1xf32>
    %26 = arith.mulf %23, %23 : vector<8x1xf32>
    %27 = arith.subf %25, %26 : vector<8x1xf32>
    %cst_13 = arith.constant 9.99999974E-6 : f32
    %28 = vector.broadcast %cst_13 : f32 to vector<8x1xf32>
    %29 = arith.addf %27, %28 : vector<8x1xf32>
    %30 = math.rsqrt %29 : vector<8x1xf32>
    %31 = arith.mulf %13, %30 : vector<8x1xf32>
    %32 = vector.broadcast %31 : vector<8x1xf32> to vector<8x768xf32>
    %33 = arith.mulf %32, %12 : vector<8x768xf32>
    %34 = arith.mulf %31, %23 : vector<8x1xf32>
    %35 = arith.subf %14, %34 : vector<8x1xf32>
    %36 = vector.broadcast %35 : vector<8x1xf32> to vector<8x768xf32>
    %37 = arith.addf %33, %36 : vector<8x768xf32>
    %cst_14 = arith.constant 0.000000e+00 : f32
    %38 = vector.broadcast %cst_14 : f32 to vector<8x768xf32>
    %39 = arith.maximumf %37, %38 : vector<8x768xf32>
    %40 = vector.broadcast %0 : vector<1x768xf32> to vector<8x768xf32>
    %41 = arith.mulf %39, %40 : vector<8x768xf32>
    %c0_15 = arith.constant 0 : index
    %c0_16 = arith.constant 0 : index
    %42 = vector.load %arg4[%c0_15, %c0_16] : memref<8x72xf32, #tpu.memory_space<vmem>>, vector<8x72xf32>
    %c19_i32_17 = arith.constant 19 : i32
    %43 = tpu.dynamic_rotate %41 by %c19_i32_17 dim 1 : vector<8x768xf32>, i32 -> vector<8x768xf32>
    %c18_i32_18 = arith.constant 18 : i32
    %44 = tpu.dynamic_rotate %41 by %c18_i32_18 dim 1 : vector<8x768xf32>, i32 -> vector<8x768xf32>
    %c17_i32_19 = arith.constant 17 : i32
    %45 = tpu.dynamic_rotate %41 by %c17_i32_19 dim 1 : vector<8x768xf32>, i32 -> vector<8x768xf32>
    %c1_i32_20 = arith.constant 1 : i32
    %46 = tpu.dynamic_rotate %41 by %c1_i32_20 dim 1 : vector<8x768xf32>, i32 -> vector<8x768xf32>
    %c767_i32_21 = arith.constant 767 : i32
    %47 = tpu.dynamic_rotate %41 by %c767_i32_21 dim 1 : vector<8x768xf32>, i32 -> vector<8x768xf32>
    %c751_i32_22 = arith.constant 751 : i32
    %48 = tpu.dynamic_rotate %41 by %c751_i32_22 dim 1 : vector<8x768xf32>, i32 -> vector<8x768xf32>
    %c750_i32_23 = arith.constant 750 : i32
    %49 = tpu.dynamic_rotate %41 by %c750_i32_23 dim 1 : vector<8x768xf32>, i32 -> vector<8x768xf32>
    %c749_i32_24 = arith.constant 749 : i32
    %50 = tpu.dynamic_rotate %41 by %c749_i32_24 dim 1 : vector<8x768xf32>, i32 -> vector<8x768xf32>
    %51 = tpu.concatenate %43, %44, %45, %46, %41, %47, %48, %49, %50 in 0 : vector<8x768xf32>, vector<8x768xf32>, vector<8x768xf32>, vector<8x768xf32>, vector<8x768xf32>, vector<8x768xf32>, vector<8x768xf32>, vector<8x768xf32>, vector<8x768xf32> -> vector<72x768xf32>
    %cst_25 = arith.constant dense<0.000000e+00> : vector<8x768xf32>
    %52 = tpu.matmul %42, %51, %cst_25 {dimension_numbers = #tpu.dot_dimension_numbers<[1], [0], [0], [1], [0, 0, 1, 1], [], []>} : vector<8x72xf32>, vector<72x768xf32>, vector<8x768xf32> -> vector<8x768xf32>
    %c0_26 = arith.constant 0 : index
    %c0_27 = arith.constant 0 : index
    %53 = vector.load %arg7[%c0_26, %c0_27] : memref<8x1xf32, #tpu.memory_space<vmem>>, vector<8x1xf32>
    %c0_28 = arith.constant 0 : index
    %c0_29 = arith.constant 0 : index
    %54 = vector.load %arg8[%c0_28, %c0_29] : memref<8x1xf32, #tpu.memory_space<vmem>>, vector<8x1xf32>
    %55 = vector.broadcast %0 : vector<1x768xf32> to vector<8x768xf32>
    %56 = arith.mulf %52, %55 : vector<8x768xf32>
    %cst_30 = arith.constant dense<0.000000e+00> : vector<8xf32>
    %57 = vector.multi_reduction <add>, %56, %cst_30 [1] : vector<8x768xf32> to vector<8xf32>
    %58 = vector.shape_cast %57 : vector<8xf32> to vector<8x1xf32>
    %59 = arith.mulf %56, %52 : vector<8x768xf32>
    %cst_31 = arith.constant dense<0.000000e+00> : vector<8xf32>
    %60 = vector.multi_reduction <add>, %59, %cst_31 [1] : vector<8x768xf32> to vector<8xf32>
    %61 = vector.shape_cast %60 : vector<8xf32> to vector<8x1xf32>
    %cst_32 = arith.constant 0.001953125 : f32
    %62 = vector.broadcast %cst_32 : f32 to vector<8x1xf32>
    %63 = arith.mulf %58, %62 : vector<8x1xf32>
    %cst_33 = arith.constant 0.001953125 : f32
    %64 = vector.broadcast %cst_33 : f32 to vector<8x1xf32>
    %65 = arith.mulf %61, %64 : vector<8x1xf32>
    %66 = arith.mulf %63, %63 : vector<8x1xf32>
    %67 = arith.subf %65, %66 : vector<8x1xf32>
    %cst_34 = arith.constant 9.99999974E-6 : f32
    %68 = vector.broadcast %cst_34 : f32 to vector<8x1xf32>
    %69 = arith.addf %67, %68 : vector<8x1xf32>
    %70 = math.rsqrt %69 : vector<8x1xf32>
    %71 = arith.mulf %53, %70 : vector<8x1xf32>
    %72 = vector.broadcast %71 : vector<8x1xf32> to vector<8x768xf32>
    %73 = arith.mulf %72, %52 : vector<8x768xf32>
    %74 = arith.mulf %71, %63 : vector<8x1xf32>
    %75 = arith.subf %54, %74 : vector<8x1xf32>
    %76 = vector.broadcast %75 : vector<8x1xf32> to vector<8x768xf32>
    %77 = arith.addf %73, %76 : vector<8x768xf32>
    %c0_35 = arith.constant 0 : index
    %c0_36 = arith.constant 0 : index
    %78 = vector.load %arg2[%c0_35, %c0_36] : memref<8x768xf32, #tpu.memory_space<vmem>>, vector<8x768xf32>
    %79 = arith.addf %77, %78 : vector<8x768xf32>
    %cst_37 = arith.constant 0.000000e+00 : f32
    %80 = vector.broadcast %cst_37 : f32 to vector<8x768xf32>
    %81 = arith.maximumf %79, %80 : vector<8x768xf32>
    %c0_38 = arith.constant 0 : index
    %c0_39 = arith.constant 0 : index
    %82 = vector.load %arg10[%c0_38, %c0_39] : memref<8x768xf32, #tpu.memory_space<vmem>>, vector<8x768xf32>
    tpu.vector_store %arg10[%c0_38, %c0_39], %81 {strides = array<i32>} : memref<8x768xf32, #tpu.memory_space<vmem>>, vector<8x768xf32>,
    return
  }
  func.func @transform_0(%arg0: i32) -> (i32, i32) {
    %c0_i32 = arith.constant 0 : i32
    %c0_i32_0 = arith.constant 0 : i32
    %c0_i32_1 = arith.constant 0 : i32
    return %c0_i32, %c0_i32_0 : i32, i32
  }
  func.func @transform_1(%arg0: i32) -> (i32, i32) {
    %c0_i32 = arith.constant 0 : i32
    %c0_i32_0 = arith.constant 0 : i32
    %c0_i32_1 = arith.constant 0 : i32
    return %c0_i32, %c0_i32_0 : i32, i32
  }
  func.func @transform_2(%arg0: i32) -> (i32, i32) {
    %c0_i32 = arith.constant 0 : i32
    %c0_i32_0 = arith.constant 0 : i32
    %c0_i32_1 = arith.constant 0 : i32
    return %c0_i32, %c0_i32_0 : i32, i32
  }
  func.func @transform_3(%arg0: i32) -> (i32, i32) {
    %c0_i32 = arith.constant 0 : i32
    %c0_i32_0 = arith.constant 0 : i32
    %c0_i32_1 = arith.constant 0 : i32
    return %c0_i32, %c0_i32_0 : i32, i32
  }
  func.func @transform_4(%arg0: i32) -> (i32, i32) {
    %c0_i32 = arith.constant 0 : i32
    %c0_i32_0 = arith.constant 0 : i32
    %c0_i32_1 = arith.constant 0 : i32
    return %c0_i32, %c0_i32_0 : i32, i32
  }
  func.func @transform_5(%arg0: i32) -> (i32, i32) {
    %c0_i32 = arith.constant 0 : i32
    %c0_i32_0 = arith.constant 0 : i32
    %c0_i32_1 = arith.constant 0 : i32
    return %c0_i32, %c0_i32_0 : i32, i32
  }
  func.func @transform_6(%arg0: i32) -> (i32, i32) {
    %c0_i32 = arith.constant 0 : i32
    %c0_i32_0 = arith.constant 0 : i32
    %c0_i32_1 = arith.constant 0 : i32
    return %c0_i32, %c0_i32_0 : i32, i32
  }
  func.func @transform_7(%arg0: i32) -> (i32, i32) {
    %c0_i32 = arith.constant 0 : i32
    %c0_i32_0 = arith.constant 0 : i32
    %c0_i32_1 = arith.constant 0 : i32
    return %c0_i32, %c0_i32_0 : i32, i32
  }
  func.func @transform_8(%arg0: i32) -> (i32, i32) {
    %c0_i32 = arith.constant 0 : i32
    %c0_i32_0 = arith.constant 0 : i32
    %c0_i32_1 = arith.constant 0 : i32
    return %c0_i32, %c0_i32_0 : i32, i32
  }
  func.func @transform_9(%arg0: i32) -> (i32, i32) {
    %c0_i32 = arith.constant 0 : i32
    %c0_i32_0 = arith.constant 0 : i32
    %c0_i32_1 = arith.constant 0 : i32
    return %c0_i32, %c0_i32_0 : i32, i32
  }
}

</mosaic_0001>

<bundles_post_ra>
// kernel: _lambda_.1
= control target key start
LH: loop header
LB: loop body
LE: loop exit
PB: predicated region body
PF: predicated region fallthrough
CT: control target
= control target key end

     0   :  { %s1259_s17 = smov 19   ;;  %s1260_s18 = smov 18   ;;  %v1266_v10 = vmov 0.0   ;;  %v52_v11 = vlaneseq  ;;  %vm194_vm8 = vcmask 588800   ;;  %s2007_s0 = inlined_call_operand.vmem [shape: f32[8,768], index: 0, kind: input, shape index: {}]   ;;  %s2008_s2 = inlined_call_operand.vmem [shape: f32[8,72], index: 2, kind: input, shape index: {}]   ;;  %s2009_s8 = inlined_call_operand.vmem [shape: f32[1,768], index: 8, kind: input, shape index: {}]   ;;  %s2010_s4 = inlined_call_operand.vmem [shape: f32[8,1], index: 4, kind: input, shape index: {}]   ;;  %s2011_s5 = inlined_call_operand.vmem [shape: f32[8,1], index: 5, kind: input, shape index: {}]   ;;  %s2012_s3 = inlined_call_operand.vmem [shape: f32[8,72], index: 3, kind: input, shape index: {}]   ;;  %s2013_s6 = inlined_call_operand.vmem [shape: f32[8,1], index: 6, kind: input, shape index: {}]   ;;  %s2014_s7 = inlined_call_operand.vmem [shape: f32[8,1], index: 7, kind: input, shape index: {}]   ;;  %s2015_s1 = inlined_call_operand.vmem [shape: f32[8,768], index: 1, kind: input, shape index: {}]   ;;  %s2016_s9 = inlined_call_operand.vmem [shape: f32[8,768], index: 9, kind: output, shape index: {}]  }
   0x1   :  { %v1322_v0 = vld [vmem:[%s2007_s0 + $0x10] sm:$0xff]  ;;  %v1327_v1 = vld [vmem:[%s2007_s0 + $0x28] sm:$0xff]  ;;  %v1332_v2 = vld [vmem:[%s2007_s0] sm:$0xff]  ;;  %s1261_s19 = smov 1   ;;  %s1262_s20 = smov 17   ;;  %262 = vmatprep.mubr.f32.mxu0 %v1266_v10  ;;  %333 = vmatprep.mubr.f32.mxu1 %v1266_v10 }
   0x2   :  { %v1083_v3 = vpack.i.bf16 %v1322_v0, %v1327_v1  ;;  %v1339_v4 = vld [vmem:[%s2007_s0 + $0x8] sm:$0xff]  ;;  %s1263_s21 = smov 127   ;;  %s1264_s22 = smov 110   ;;  %v1361_v7 = vld [vmem:[%s2007_s0 + $0x18] sm:$0xff]  ;;  %v1366_v8 = vld [vmem:[%s2007_s0 + $0x20] sm:$0xff]  ;;  %v1406_v14 = vand.u32 127, %v52_v11 }
   0x3   :  { %v1073_v5 = vpack.i.bf16 %v1339_v4, %v1332_v2  ;;  %v1113_v6 = vpack.i.bf16 %v1322_v0, %v1339_v4  ;;  %s1265_s23 = smov 111   ;;  %v1133_v9 = vpack.i.bf16 %v1366_v8, %v1361_v7  ;;  %s1267_s0 = smov 109  }
   0x4   :  { %1084 = vrot.lane.b32.xlu1 %v1083_v3, %s1259_s17  ;;  %vm54_vm0 = vcmp.lt.s32.totalorder %v1406_v14, 19  ;;  %vm73_vm1 = vcmp.lt.s32.totalorder %v1406_v14, 18  ;;  %vm92_vm2 = vcmp.lt.s32.totalorder %v1406_v14, 17  ;;  %vm111_vm3 = vcmp.lt.s32.totalorder %v1406_v14, 1 }
   0x5   :  { %1074 = vrot.lane.b32.xlu0 %v1073_v5, %s1259_s17  ;;  %vm130_vm4 = vcmp.lt.s32.totalorder %v1406_v14, 127  ;;  %vm168_vm5 = vcmp.lt.s32.totalorder %v1406_v14, 110  ;;  %vm149_vm6 = vcmp.lt.s32.totalorder %v1406_v14, 111  ;;  %vm187_vm7 = vcmp.lt.s32.totalorder %v1406_v14, 109 }
   0x8   :  { %1089 = vrot.lane.b32.xlu1 %v1083_v3, %s1260_s18 }
   0x9   :  { %1079 = vrot.lane.b32.xlu0 %v1073_v5, %s1260_s18 }
   0xc   :  { %1099 = vrot.lane.b32.xlu1 %v1073_v5, %s1261_s19 }
   0xd   :  { %1094 = vrot.lane.b32.xlu0 %v1073_v5, %s1262_s20 }
  0x10   :  { %1109 = vrot.lane.b32.xlu1 %v1083_v3, %s1261_s19 }
  0x11   :  { %1104 = vrot.lane.b32.xlu0 %v1083_v3, %s1262_s20 }
  0x14   :  { %118 = vrot.lane.b32.xlu1 %v1332_v2, %s1263_s21 }
  0x15   :  { %1114 = vrot.lane.b32.xlu0 %v1113_v6, %s1263_s21 }
  0x18   :  { %1124 = vrot.lane.b32.xlu1 %v1113_v6, %s1264_s22 }
  0x19   :  { %1119 = vrot.lane.b32.xlu0 %v1113_v6, %s1265_s23 }
  0x1c   :  { %156 = vrot.lane.b32.xlu1 %v1332_v2, %s1264_s22 }
  0x1d   :  { %137 = vrot.lane.b32.xlu0 %v1332_v2, %s1265_s23 }
  0x20   :  { %1134 = vrot.lane.b32.xlu1 %v1133_v9, %s1260_s18 }
  0x21   :  { %1129 = vrot.lane.b32.xlu0 %v1133_v9, %s1259_s17 }
  0x24   :  { %1144 = vrot.lane.b32.xlu1 %v1133_v9, %s1261_s19 }
  0x25   :  { %1139 = vrot.lane.b32.xlu0 %v1133_v9, %s1262_s20 }
  0x28   :  { %179 = vrot.lane.b32.xlu1 %v1322_v0, %s1267_s0 }
  0x29   :  { %177 = vrot.lane.b32.xlu0 %v1339_v4, %s1267_s0 }
  0x2c   :  { %1149 = vrot.lane.b32.xlu1 %v1133_v9, %s1263_s21 }
  0x2d   :  { %175 = vrot.lane.b32.xlu0 %v1332_v2, %s1267_s0 }
  0x30   :  { %1154 = vrot.lane.b32.xlu1 %v1133_v9, %s1265_s23 }
  0x31   :  { %128 = vrot.lane.b32.xlu0 %v1327_v1, %s1263_s21 }
  0x34   :  { %147 = vrot.lane.b32.xlu1 %v1327_v1, %s1265_s23 }
  0x35   :  { %1159 = vrot.lane.b32.xlu0 %v1133_v9, %s1264_s22 }
  0x38   :  { %181 = vrot.lane.b32.xlu1 %v1361_v7, %s1267_s0 }
  0x39   :  { %166 = vrot.lane.b32.xlu0 %v1327_v1, %s1264_s22 }
  0x3c   :  { %185 = vrot.lane.b32.xlu1 %v1327_v1, %s1267_s0 }
  0x3d   :  { %183 = vrot.lane.b32.xlu0 %v1366_v8, %s1267_s0 }
  0x76   :  { %v1401_v12 = vpop.permute.xlu1 %1084 }
  0x77   :  { %v1403_v13 = vpop.permute.xlu0 %1074  ;;  %v1086_v15 = vunpack.i.l.bf16 %v1401_v12  ;;  %v1087_v9 = vunpack.i.h.bf16 %v1401_v12 }
  0x78   :  { %v1077_v16 = vunpack.i.h.bf16 %v1403_v13  ;;  %v1076_v17 = vunpack.i.l.bf16 %v1403_v13 }
  0x7a   :  { %v1411_v18 = vpop.permute.xlu1 %1089  ;;  %v59_v24 = vsel %vm54_vm0, %v1076_v17, %v1077_v16  ;;  %v60_v26 = vsel %vm54_vm0, %v1086_v15, %v1076_v17 }
  0x7b   :  { %v1091_v19 = vunpack.i.l.bf16 %v1411_v18  ;;  %v1414_v20 = vpop.permute.xlu0 %1079 }
  0x7c   :  { %v1082_v21 = vunpack.i.h.bf16 %v1414_v20  ;;  %v1081_v22 = vunpack.i.l.bf16 %v1414_v20 }
  0x7e   :  { %v1422_v23 = vpop.permute.xlu1 %1099  ;;  %v78_v25 = vsel %vm73_vm1, %v1081_v22, %v1082_v21  ;;  %v79_v27 = vsel %vm73_vm1, %v1091_v19, %v1081_v22 }
  0x7f   :  { %v1102_v28 = vunpack.i.h.bf16 %v1422_v23  ;;  %v1101_v29 = vunpack.i.l.bf16 %v1422_v23  ;;  %v1442_v30 = vpop.permute.xlu0 %1094  ;;  %v967_v31 = vpack.c.bf16 %v78_v25, %v59_v24  ;;  %v969_v32 = vpack.c.bf16 %v79_v27, %v60_v26 }
  0x80   :  { %v1097_v33 = vunpack.i.h.bf16 %v1442_v30  ;;  %v1096_v34 = vunpack.i.l.bf16 %v1442_v30 }
  0x81   :  { %968 = vmatprep.subr.bf16.mxu0 %v967_v31  ;;  %v116_v35 = vsel %vm111_vm3, %v1101_v29, %v1102_v28 }
  0x82   :  { %970 = vmatpush1.bf16.msra.mxu0 %v969_v32  ;;  %v1450_v36 = vpop.permute.xlu1 %1109  ;;  %v97_v37 = vsel %vm92_vm2, %v1096_v34, %v1097_v33 }
  0x83   :  { %v1111_v38 = vunpack.i.l.bf16 %v1450_v36  ;;  %v1457_v39 = vpop.permute.xlu0 %1104  ;;  %v971_v40 = vpack.c.bf16 %v116_v35, %v97_v37  ;;  %v1112_v25 = vunpack.i.h.bf16 %v1450_v36 }
  0x84   :  { %v1106_v41 = vunpack.i.l.bf16 %v1457_v39  ;;  %v1107_v26 = vunpack.i.h.bf16 %v1457_v39 }
  0x85   :  { %972 = vmatprep.subr.bf16.mxu0 %v971_v40  ;;  %v117_v42 = vsel %vm111_vm3, %v1111_v38, %v1101_v29  ;;  %v58_v40 = vsel %vm54_vm0, %v1077_v16, %v1087_v9  ;;  %v115_v13 = vsel %vm111_vm3, %v1102_v28, %v1112_v25 }
  0x86   :  { %v1464_v43 = vpop.permute.xlu1 %118  ;;  %v98_v44 = vsel %vm92_vm2, %v1106_v41, %v1096_v34 }
  0x87   :  { %v1470_v45 = vpop.permute.xlu0 %1114  ;;  %v973_v46 = vpack.c.bf16 %v117_v42, %v98_v44 }
  0x88   :  { %v1117_v47 = vunpack.i.h.bf16 %v1470_v45  ;;  %v1116_v48 = vunpack.i.l.bf16 %v1470_v45 }
  0x89   :  { %974 = vmatpush1.bf16.msra.mxu0 %v973_v46 }
  0x8a   :  { %v1475_v49 = vpop.permute.xlu1 %1124  ;;  %v134_v50 = vsel %vm130_vm4, %v1116_v48, %v1117_v47  ;;  %v135_v51 = vsel %vm130_vm4, %v1464_v43, %v1116_v48  ;;  %v96_v48 = vsel %vm92_vm2, %v1097_v33, %v1107_v26 }
  0x8b   :  { %v1127_v52 = vunpack.i.h.bf16 %v1475_v49  ;;  %v1126_v53 = vunpack.i.l.bf16 %v1475_v49  ;;  %v1488_v54 = vpop.permute.xlu0 %1119  ;;  %v975_v55 = vpack.c.bf16 %v134_v50, %v1339_v4  ;;  %v977_v56 = vpack.c.bf16 %v135_v51, %v1332_v2 }
  0x8c   :  { %v1122_v57 = vunpack.i.h.bf16 %v1488_v54  ;;  %v1121_v58 = vunpack.i.l.bf16 %v1488_v54  ;;  %v1092_v4 = vunpack.i.h.bf16 %v1411_v18  ;;  %v989_v33 = vpack.c.bf16 %v115_v13, %v96_v48 }
  0x8d   :  { %976 = vmatprep.subr.bf16.mxu0 %v975_v55  ;;  %v172_v59 = vsel %vm168_vm5, %v1126_v53, %v1127_v52 }
  0x8e   :  { %978 = vmatpush1.bf16.msra.mxu0 %v977_v56  ;;  %v1498_v60 = vpop.permute.xlu1 %156  ;;  %v153_v61 = vsel %vm149_vm6, %v1121_v58, %v1122_v57  ;;  %v77_v29 = vsel %vm73_vm1, %v1082_v21, %v1092_v4 }
  0x8f   :  { %v173_v62 = vsel %vm168_vm5, %v1498_v60, %v1126_v53  ;;  %v1507_v63 = vpop.permute.xlu0 %137  ;;  %v979_v2 = vpack.c.bf16 %v172_v59, %v153_v61  ;;  %v985_v46 = vpack.c.bf16 %v77_v29, %v58_v40 }
  0x90   :  { %v154_v3 = vsel %vm149_vm6, %v1507_v63, %v1121_v58 }
  0x91   :  { %v981_v5 = vpack.c.bf16 %v173_v62, %v154_v3  ;;  %980 = vmatprep.subr.bf16.mxu0 %v979_v2 }
  0x92   :  { %v1135_v6 = vpop.permute.xlu1 %1134 }
  0x93   :  { %v1136_v17 = vunpack.i.l.bf16 %v1135_v6  ;;  %v1130_v22 = vpop.permute.xlu0 %1129  ;;  %982 = vmatpush1.bf16.msra.mxu0 %v981_v5  ;;  %v1137_v42 = vunpack.i.h.bf16 %v1135_v6 }
  0x94   :  { %v1131_v24 = vunpack.i.l.bf16 %v1130_v22  ;;  %v1132_v20 = vunpack.i.h.bf16 %v1130_v22 }
  0x95   :  { %v76_v27 = vsel %vm73_vm1, %v1092_v4, %v1136_v17  ;;  %v75_v30 = vsel %vm73_vm1, %v1136_v17, %v1137_v42  ;;  %v74_v59 = vsel %vm73_vm1, %v1137_v42, %v1091_v19  ;;  %v1561_v4 = vld [vmem:[%s2008_s2] sm:$0xff] }
  0x96   :  { %v1145_v31 = vpop.permute.xlu1 %1144  ;;  %v57_v32 = vsel %vm54_vm0, %v1087_v9, %v1131_v24  ;;  %v56_v28 = vsel %vm54_vm0, %v1131_v24, %v1132_v20  ;;  %v55_v58 = vsel %vm54_vm0, %v1132_v20, %v1086_v15 }
  0x97   :  { %v1146_v34 = vunpack.i.l.bf16 %v1145_v31  ;;  %v1140_v35 = vpop.permute.xlu0 %1139  ;;  %v983_v37 = vpack.c.bf16 %v76_v27, %v57_v32  ;;  %v1147_v51 = vunpack.i.h.bf16 %v1145_v31  ;;  %v1001_v18 = vpack.c.bf16 %v75_v30, %v56_v28 }
  0x98   :  { %v1141_v44 = vunpack.i.l.bf16 %v1140_v35  ;;  %v1142_v53 = vunpack.i.h.bf16 %v1140_v35  ;;  %v999_v5 = vpack.c.bf16 %v74_v59, %v55_v58 }
  0x99   :  { %984 = vmatprep.subr.bf16.mxu1 %v983_v37  ;;  %v114_v21 = vsel %vm111_vm3, %v1112_v25, %v1146_v34  ;;  %v112_v15 = vsel %vm111_vm3, %v1147_v51, %v1111_v38  ;;  %v113_v6 = vsel %vm111_vm3, %v1146_v34, %v1147_v51  ;;  %v415_v51 = vshrl.u32 %v52_v11, 7 }
  0x9a   :  { %986 = vmatpush1.bf16.msra.mxu1 %v985_v46  ;;  %v1539_v16 = vpop.permute.xlu1 %179  ;;  %v95_v50 = vsel %vm92_vm2, %v1107_v26, %v1141_v44  ;;  %v93_v12 = vsel %vm92_vm2, %v1142_v53, %v1106_v41  ;;  %v94_v9 = vsel %vm92_vm2, %v1141_v44, %v1142_v53 }
  0x9b   :  { %v178_v55 = vpop.permute.xlu0 %177  ;;  %v987_v56 = vpack.c.bf16 %v114_v21, %v95_v50  ;;  %v1003_v41 = vpack.c.bf16 %v112_v15, %v93_v12  ;;  %v416_v53 = vsub.s32 0, %v415_v51  ;;  %v436_v15 = vsub.s32 5, %v415_v51 }
  0x9c   :  { %v191_v23 = vsel %vm187_vm7, %v178_v55, %v1539_v16 }
  0x9d   :  { %214 = vmatprep.subr.mxu0 %v191_v23  ;;  %988 = vmatprep.subr.bf16.mxu1 %v987_v56 }
  0x9e   :  { %990 = vmatpush1.bf16.msra.mxu1 %v989_v33  ;;  %v1150_v61 = vpop.permute.xlu1 %1149 }
  0x9f   :  { %v1152_v62 = vunpack.i.h.bf16 %v1150_v61  ;;  %v1151_v2 = vunpack.i.l.bf16 %v1150_v61  ;;  %v176_v3 = vpop.permute.xlu0 %175 }
  0xa0   :  { %v192_v19 = vsel %vm187_vm7, %v176_v3, %v178_v55  ;;  %v420_v55 = vsub.s32 1, %v415_v51 }
  0xa1   :  { %215 = vmatpush1.msra.mxu0 %v192_v19  ;;  %v132_v39 = vsel %vm130_vm4, %v1151_v2, %v1152_v62  ;;  %v133_v36 = vsel %vm130_vm4, %v1117_v47, %v1151_v2  ;;  %v1005_v47 = vpack.c.bf16 %v113_v6, %v94_v9  ;;  %v424_v2 = vsub.s32 2, %v415_v51 }
  0xa2   :  { %1000 = vmatprep.subr.bf16.mxu0 %v999_v5  ;;  %v1155_v38 = vpop.permute.xlu1 %1154  ;;  %961 = vmatmul.mubr.msk.f32.vlgmr.msra.gmra.mrb[0].mxu0 %vm194_vm8, %v1561_v4  ;;  %v991_v17 = vpack.c.bf16 %v132_v39, %v1361_v7  ;;  %v993_v22 = vpack.c.bf16 %v133_v36, %v1322_v0 }
  0xa3   :  { %v129_v24 = vpop.permute.xlu0 %128  ;;  %1002 = vmatpush1.bf16.msra.mxu0 %v1001_v18  ;;  %404 = vmatprep.mubr.f32.mxu0 %v1266_v10  ;;  %v1157_v25 = vunpack.i.h.bf16 %v1155_v38  ;;  %v1156_v27 = vunpack.i.l.bf16 %v1155_v38 }
  0xa4   :  { %v136_v45 = vsel %vm130_vm4, %v129_v24, %v1464_v43  ;;  %1004 = vmatprep.subr.bf16.mxu0 %v1003_v41  ;;  %992 = vmatprep.subr.bf16.mxu1 %v991_v17  ;;  %v131_v7 = vsel %vm130_vm4, %v1152_v62, %v129_v24 }
  0xa5   :  { %v1007_v26 = vpack.c.bf16 %v136_v45, %v1327_v1  ;;  %994 = vmatpush1.bf16.msra.mxu1 %v993_v22  ;;  %v151_v34 = vsel %vm149_vm6, %v1156_v27, %v1157_v25  ;;  %v1009_v43 = vpack.c.bf16 %v131_v7, %v1366_v8  ;;  %v152_v37 = vsel %vm149_vm6, %v1122_v57, %v1156_v27 }
  0xa6   :  { %v148_v0 = vpop.permute.xlu1 %147 }
  0xa7   :  { %v1160_v29 = vpop.permute.xlu0 %1159  ;;  %1006 = vmatpush1.bf16.msra.mxu0 %v1005_v47  ;;  %v150_v8 = vsel %vm149_vm6, %v1157_v25, %v148_v0  ;;  %v155_v20 = vsel %vm149_vm6, %v148_v0, %v1507_v63 }
  0xa8   :  { %v1162_v31 = vunpack.i.h.bf16 %v1160_v29  ;;  %v1161_v32 = vunpack.i.l.bf16 %v1160_v29  ;;  %1008 = vmatprep.subr.bf16.mxu0 %v1007_v26 }
  0xaa   :  { %v182_v35 = vpop.permute.xlu1 %181  ;;  %v170_v1 = vsel %vm168_vm5, %v1161_v32, %v1162_v31  ;;  %v171_v40 = vsel %vm168_vm5, %v1127_v52, %v1161_v32 }
  0xab   :  { %v167_v42 = vpop.permute.xlu0 %166  ;;  %1010 = vmatpush1.bf16.msra.mxu0 %v1009_v43  ;;  %v995_v44 = vpack.c.bf16 %v170_v1, %v151_v34  ;;  %v997_v46 = vpack.c.bf16 %v171_v40, %v152_v37  ;;  %v1268_v43 = vmov 0  }
  0xac   :  { %v169_v54 = vsel %vm168_vm5, %v1162_v31, %v167_v42  ;;  %v174_v49 = vsel %vm168_vm5, %v167_v42, %v1498_v60  ;;  %v190_v60 = vsel %vm187_vm7, %v1539_v16, %v182_v35  ;;  %v32_v16 = vld [vmem:[%s2009_s8] sm:$0x3f]  ;;  %1163 = vset.pattern.permute.xlu0 %v1268_v43  ;;  %1164 = vset.pattern.permute.xlu1 %v1268_v43 }
  0xad   :  { %v1011_v57 = vpack.c.bf16 %v174_v49, %v155_v20  ;;  %v1013_v52 = vpack.c.bf16 %v169_v54, %v150_v8  ;;  %996 = vmatprep.subr.bf16.mxu1 %v995_v44  ;;  %v1636_v56 = vrot.slane %v32_v16, %v416_v53  ;;  %v1638_v30 = vrot.slane %v32_v16, %v420_v55  ;;  %v411_v8 = vld [vmem:[%s2010_s4] sm:$0xff] }
  0xae   :  { %998 = vmatpush1.bf16.msra.mxu1 %v997_v46  ;;  %v186_v21 = vpop.permute.xlu1 %185  ;;  %v1642_v12 = vrot.slane %v32_v16, %v424_v2  ;;  %v1651_v39 = vrot.slane %v32_v16, %v436_v15  ;;  %v412_v49 = vld [vmem:[%s2011_s5] sm:$0xff] }
  0xaf   :  { %v184_v48 = vpop.permute.xlu0 %183  ;;  %1012 = vmatprep.subr.bf16.mxu0 %v1011_v57  ;;  %v193_v13 = vsel %vm187_vm7, %v186_v21, %v176_v3  ;;  %v428_v3 = vsub.s32 3, %v415_v51 }
  0xb0   :  { %1014 = vmatpush1.bf16.msra.mxu0 %v1013_v52  ;;  %v189_v63 = vsel %vm187_vm7, %v182_v35, %v184_v48  ;;  %v188_v50 = vsel %vm187_vm7, %v184_v48, %v186_v21 }
  0xb1   :  { %285 = vmatprep.subr.mxu1 %v189_v63  ;;  %356 = vmatprep.subr.mxu0 %v193_v13  ;;  %v1644_v18 = vrot.slane %v32_v16, %v428_v3 }
  0xb2   :  { %286 = vmatpush1.msra.mxu1 %v190_v60 }
  0xb3   :  { %962 = vmatmul.mubr.msk.f32.vlgmr.msra.gmra.mrb[0].mxu1 %vm194_vm8, %v1561_v4 }
  0xb4   :  { %357 = vmatpush1.msra.mxu0 %v188_v50  ;;  %725 = vmatprep.mubr.f32.mxu1 %v1266_v10 }
  0xb5   :  { %963 = vmatmul.mubr.msk.f32.vlgmr.msra.gmra.mrb[2].mxu0 %vm194_vm8, %v1561_v4  ;;  %v432_v4 = vsub.s32 4, %v415_v51 }
  0xb6   :  { %796 = vmatprep.mubr.f32.mxu0 %v1266_v10 }
  0xb7   :  { %v1646_v19 = vrot.slane %v32_v16, %v432_v4 }
 0x175   :  { %v264_v23 = vpop.f32.mrb[0].mxu0 }
 0x176   :  { %v444_v33 = vmul.f32 %v1636_v56, %v264_v23  ;;  %v266_v28 = vpop.f32.mrb[1].mxu0 }
 0x177   :  { %v445_v58 = vmul.f32 %v1638_v30, %v266_v28 }
 0x178   :  { %v457_v59 = vmul.f32 %v444_v33, %v264_v23 }
 0x179   :  { %v450_v61 = vadd.f32 %v445_v58, %v444_v33  ;;  %v458_v62 = vmul.f32 %v445_v58, %v266_v28 }
 0x17b   :  { %v463_v11 = vadd.f32 %v458_v62, %v457_v59 }
 0x186   :  { %v335_v5 = vpop.f32.mrb[0].mxu1 }
 0x187   :  { %v446_v6 = vmul.f32 %v1642_v12, %v335_v5  ;;  %v1649_v9 = vpop.f32.mrb[1].mxu1 }
 0x188   :  { %v447_v36 = vmul.f32 %v1644_v18, %v1649_v9  ;;  %v406_v38 = vpop.f32.mrb[2].mxu0 }
 0x189   :  { %v451_v41 = vadd.f32 %v450_v61, %v446_v6  ;;  %v459_v17 = vmul.f32 %v446_v6, %v335_v5  ;;  %v448_v22 = vmul.f32 %v1646_v19, %v406_v38  ;;  %v408_v24 = vpop.f32.mrb[3].mxu0 }
 0x18a   :  { %v460_v25 = vmul.f32 %v447_v36, %v1649_v9  ;;  %v449_v47 = vmul.f32 %v1651_v39, %v408_v24 }
 0x18b   :  { %v464_v45 = vadd.f32 %v463_v11, %v459_v17  ;;  %v452_v26 = vadd.f32 %v451_v41, %v447_v36  ;;  %v461_v27 = vmul.f32 %v448_v22, %v406_v38 }
 0x18c   :  { %v462_v31 = vmul.f32 %v449_v47, %v408_v24 }
 0x18d   :  { %v453_v7 = vadd.f32 %v452_v26, %v448_v22  ;;  %v465_v0 = vadd.f32 %v464_v45, %v460_v25 }
 0x18f   :  { %v454_v29 = vadd.f32 %v453_v7, %v449_v47  ;;  %v466_v32 = vadd.f32 %v465_v0, %v461_v27 }
 0x191   :  { %455 = vadd.xlane.f32.xlu0 %v454_v29  ;;  %v467_v34 = vadd.f32 %v466_v32, %v462_v31 }
 0x193   :  { %468 = vadd.xlane.f32.xlu1 %v467_v34 }
 0x21e   :  { %v456_v35 = vpop.xlane.xlu0 %455 }
 0x21f   :  { %v470_v1 = vmul.f32 0.001953125, %v456_v35 }
 0x220   :  { %v469_v37 = vpop.xlane.xlu1 %468 }
 0x221   :  { %v472_v40 = vmul.f32 %v470_v1, %v470_v1  ;;  %v471_v42 = vmul.f32 0.001953125, %v469_v37 }
 0x223   :  { %v473_v44 = vsub.f32 %v471_v42, %v472_v40 }
 0x225   :  { %v474_v46 = vadd.f32 1e-05, %v473_v44 }
 0x227   :  { %1255 = vrsqrt.f32 %v474_v46 }
 0x231   :  { %v1256_v20 = vpop.eup %1255 }
 0x232   :  { %v476_v54 = vmul.f32 %v1256_v20, %v411_v8 }
 0x234   :  { %479 = vperm.xlu0 %1163, %v476_v54   ;;  %v488_v57 = vmul.f32 %v476_v54, %v470_v1 }
 0x236   :  { %v489_v52 = vsub.f32 %v412_v49, %v488_v57 }
 0x238   :  { %492 = vperm.xlu1 %1164, %v489_v52  }
 0x2b3   :  { %v480_v21 = vpop.permute.xlu0 %479 }
 0x2b4   :  { %v482_v48 = vmul.f32 %v480_v21, %v264_v23  ;;  %v483_v13 = vmul.f32 %v480_v21, %v266_v28  ;;  %v484_v63 = vmul.f32 %v480_v21, %v335_v5  ;;  %v487_v60 = vmul.f32 %v480_v21, %v408_v24 }
 0x2b5   :  { %v485_v4 = vmul.f32 %v480_v21, %v1649_v9  ;;  %v486_v15 = vmul.f32 %v480_v21, %v406_v38 }
 0x2b7   :  { %v493_v50 = vpop.permute.xlu1 %492 }
 0x2b8   :  { %v495_v51 = vadd.f32 %v493_v50, %v482_v48  ;;  %v496_v53 = vadd.f32 %v493_v50, %v483_v13  ;;  %v497_v16 = vadd.f32 %v493_v50, %v484_v63  ;;  %v500_v55 = vadd.f32 %v493_v50, %v487_v60 }
 0x2b9   :  { %v498_v5 = vadd.f32 %v493_v50, %v485_v4  ;;  %v499_v6 = vadd.f32 %v493_v50, %v486_v15 }
 0x2ba   :  { %v501_v33 = vmax.f32 %v495_v51, 0.0  ;;  %v502_v58 = vmax.f32 %v496_v53, 0.0  ;;  %v503_v59 = vmax.f32 %v497_v16, 0.0  ;;  %v506_v61 = vmax.f32 %v500_v55, 0.0 }
 0x2bb   :  { %v504_v41 = vmax.f32 %v498_v5, 0.0  ;;  %v505_v17 = vmax.f32 %v499_v6, 0.0 }
 0x2bc   :  { %v1665_v62 = vmul.f32 %v501_v33, %v1636_v56  ;;  %v1668_v11 = vmul.f32 %v502_v58, %v1638_v30  ;;  %v1671_v23 = vmul.f32 %v503_v59, %v1642_v12  ;;  %v1674_v28 = vmul.f32 %v506_v61, %v1651_v39 }
 0x2bd   :  { %v1690_v9 = vmul.f32 %v504_v41, %v1644_v18  ;;  %v1693_v38 = vmul.f32 %v505_v17, %v1646_v19 }
 0x2be   :  { %v1165_v2 = vpack.i.bf16 %v1668_v11, %v1665_v62  ;;  %v1195_v3 = vpack.i.bf16 %v1671_v23, %v1674_v28  ;;  %v1205_v36 = vpack.i.bf16 %v1671_v23, %v1668_v11 }
 0x2bf   :  { %v1220_v22 = vpack.i.bf16 %v1693_v38, %v1690_v9 }
 0x2c0   :  { %1166 = vrot.lane.b32.xlu1 %v1165_v2, %s1259_s17  ;;  %1196 = vrot.lane.b32.xlu0 %v1195_v3, %s1262_s20 }
 0x2c4   :  { %1171 = vrot.lane.b32.xlu1 %v1165_v2, %s1260_s18  ;;  %1206 = vrot.lane.b32.xlu0 %v1205_v36, %s1263_s21 }
 0x2c8   :  { %1176 = vrot.lane.b32.xlu1 %v1195_v3, %s1259_s17  ;;  %1211 = vrot.lane.b32.xlu0 %v1205_v36, %s1265_s23 }
 0x2cc   :  { %1181 = vrot.lane.b32.xlu1 %v1195_v3, %s1260_s18  ;;  %604 = vrot.lane.b32.xlu0 %v1665_v62, %s1265_s23 }
 0x2d0   :  { %1186 = vrot.lane.b32.xlu1 %v1165_v2, %s1262_s20  ;;  %1221 = vrot.lane.b32.xlu0 %v1220_v22, %s1259_s17 }
 0x2d4   :  { %1191 = vrot.lane.b32.xlu1 %v1165_v2, %s1261_s19  ;;  %1231 = vrot.lane.b32.xlu0 %v1220_v22, %s1262_s20 }
 0x2d8   :  { %1201 = vrot.lane.b32.xlu1 %v1195_v3, %s1261_s19  ;;  %642 = vrot.lane.b32.xlu0 %v1668_v11, %s1267_s0 }
 0x2dc   :  { %586 = vrot.lane.b32.xlu1 %v1665_v62, %s1263_s21  ;;  %640 = vrot.lane.b32.xlu0 %v1665_v62, %s1267_s0 }
 0x2e0   :  { %1216 = vrot.lane.b32.xlu1 %v1205_v36, %s1264_s22  ;;  %596 = vrot.lane.b32.xlu0 %v1674_v28, %s1263_s21 }
 0x2e4   :  { %622 = vrot.lane.b32.xlu1 %v1665_v62, %s1264_s22  ;;  %1251 = vrot.lane.b32.xlu0 %v1220_v22, %s1264_s22 }
 0x2e8   :  { %1226 = vrot.lane.b32.xlu1 %v1220_v22, %s1260_s18  ;;  %632 = vrot.lane.b32.xlu0 %v1674_v28, %s1264_s22 }
 0x2ec   :  { %1236 = vrot.lane.b32.xlu1 %v1220_v22, %s1261_s19  ;;  %648 = vrot.lane.b32.xlu0 %v1693_v38, %s1267_s0 }
 0x2f0   :  { %644 = vrot.lane.b32.xlu1 %v1671_v23, %s1267_s0 }
 0x2f4   :  { %1241 = vrot.lane.b32.xlu1 %v1220_v22, %s1263_s21 }
 0x2f8   :  { %1246 = vrot.lane.b32.xlu1 %v1220_v22, %s1265_s23 }
 0x2fc   :  { %614 = vrot.lane.b32.xlu1 %v1674_v28, %s1265_s23 }
 0x300   :  { %646 = vrot.lane.b32.xlu1 %v1690_v9, %s1267_s0 }
 0x304   :  { %650 = vrot.lane.b32.xlu1 %v1674_v28, %s1267_s0 }
 0x332   :  { %v1733_v24 = vpop.permute.xlu1 %1166  ;;  %v1735_v25 = vpop.permute.xlu0 %1196 }
 0x333   :  { %v1169_v45 = vunpack.i.h.bf16 %v1733_v24  ;;  %v1168_v47 = vunpack.i.l.bf16 %v1733_v24  ;;  %v1198_v53 = vunpack.i.l.bf16 %v1735_v25 }
 0x335   :  { %v530_v29 = vsel %vm54_vm0, %v1168_v47, %v1169_v45 }
 0x336   :  { %v1739_v26 = vpop.permute.xlu1 %1171  ;;  %v1741_v27 = vpop.permute.xlu0 %1206 }
 0x337   :  { %v1174_v7 = vunpack.i.h.bf16 %v1739_v26  ;;  %v1173_v0 = vunpack.i.l.bf16 %v1739_v26  ;;  %v1209_v48 = vunpack.i.h.bf16 %v1741_v27  ;;  %v1208_v13 = vunpack.i.l.bf16 %v1741_v27 }
 0x339   :  { %v548_v31 = vsel %vm73_vm1, %v1173_v0, %v1174_v7  ;;  %v601_v55 = vsel %vm130_vm4, %v1208_v13, %v1209_v48 }
 0x33a   :  { %v1753_v32 = vpop.permute.xlu1 %1176  ;;  %v1015_v34 = vpack.c.bf16 %v548_v31, %v530_v29  ;;  %v1755_v43 = vpop.permute.xlu0 %1211  ;;  %v1023_v4 = vpack.c.bf16 %v601_v55, %v1668_v11 }
 0x33b   :  { %v1178_v35 = vunpack.i.l.bf16 %v1753_v32  ;;  %v1214_v15 = vunpack.i.h.bf16 %v1755_v43  ;;  %v1213_v5 = vunpack.i.l.bf16 %v1755_v43 }
 0x33c   :  { %1016 = vmatprep.subr.bf16.mxu1 %v1015_v34 }
 0x33d   :  { %v531_v40 = vsel %vm54_vm0, %v1178_v35, %v1168_v47  ;;  %v619_v11 = vsel %vm149_vm6, %v1213_v5, %v1214_v15 }
 0x33e   :  { %v1758_v1 = vpop.permute.xlu1 %1181  ;;  %v1765_v42 = vpop.permute.xlu0 %604 }
 0x33f   :  { %v1183_v37 = vunpack.i.l.bf16 %v1758_v1  ;;  %v620_v29 = vsel %vm149_vm6, %v1765_v42, %v1213_v5  ;;  %v1184_v34 = vunpack.i.h.bf16 %v1758_v1  ;;  %v1882_v1 = vld [vmem:[%s2012_s3] sm:$0xff] }
 0x341   :  { %v549_v44 = vsel %vm73_vm1, %v1183_v37, %v1173_v0 }
 0x342   :  { %v1017_v46 = vpack.c.bf16 %v549_v44, %v531_v40  ;;  %v1771_v8 = vpop.permute.xlu1 %1186  ;;  %v1777_v57 = vpop.permute.xlu0 %1221 }
 0x343   :  { %v1189_v20 = vunpack.i.h.bf16 %v1771_v8  ;;  %v1188_v54 = vunpack.i.l.bf16 %v1771_v8  ;;  %v1223_v44 = vunpack.i.l.bf16 %v1777_v57 }
 0x344   :  { %1018 = vmatpush1.bf16.msra.mxu1 %v1017_v46 }
 0x345   :  { %v566_v63 = vsel %vm92_vm2, %v1188_v54, %v1189_v20  ;;  %v567_v33 = vsel %vm92_vm2, %v1198_v53, %v1188_v54  ;;  %v1179_v54 = vunpack.i.h.bf16 %v1753_v32 }
 0x346   :  { %v1775_v49 = vpop.permute.xlu1 %1191  ;;  %v1801_v58 = vpop.permute.xlu0 %1231 }
 0x347   :  { %v1194_v52 = vunpack.i.h.bf16 %v1775_v49  ;;  %v1193_v21 = vunpack.i.l.bf16 %v1775_v49  ;;  %v528_v55 = vsel %vm54_vm0, %v1179_v54, %v1223_v44  ;;  %v529_v26 = vsel %vm54_vm0, %v1169_v45, %v1179_v54 }
 0x349   :  { %v584_v60 = vsel %vm111_vm3, %v1193_v21, %v1194_v52 }
 0x34a   :  { %v1789_v50 = vpop.permute.xlu1 %1201  ;;  %v1019_v51 = vpack.c.bf16 %v584_v60, %v566_v63  ;;  %v643_v41 = vpop.permute.xlu0 %642  ;;  %v1233_v60 = vunpack.i.l.bf16 %v1801_v58 }
 0x34b   :  { %v1203_v16 = vunpack.i.l.bf16 %v1789_v50  ;;  %v1204_v63 = vunpack.i.h.bf16 %v1789_v50 }
 0x34c   :  { %1020 = vmatprep.subr.bf16.mxu1 %v1019_v51 }
 0x34d   :  { %v585_v59 = vsel %vm111_vm3, %v1203_v16, %v1193_v21 }
 0x34e   :  { %v1021_v61 = vpack.c.bf16 %v585_v59, %v567_v33  ;;  %v1807_v2 = vpop.permute.xlu1 %586  ;;  %v1838_v46 = vpop.permute.xlu0 %640  ;;  %v1199_v59 = vunpack.i.h.bf16 %v1735_v25 }
 0x34f   :  { %v602_v3 = vsel %vm130_vm4, %v1807_v2, %v1208_v13  ;;  %v547_v13 = vsel %vm73_vm1, %v1174_v7, %v1184_v34 }
 0x350   :  { %1022 = vmatpush1.bf16.msra.mxu1 %v1021_v61  ;;  %v1025_v6 = vpack.c.bf16 %v602_v3, %v1665_v62  ;;  %v1033_v3 = vpack.c.bf16 %v547_v13, %v529_v26  ;;  %v564_v24 = vsel %vm92_vm2, %v1199_v59, %v1233_v60 }
 0x351   :  { %1024 = vmatprep.subr.bf16.mxu1 %v1023_v4  ;;  %v1224_v4 = vunpack.i.h.bf16 %v1777_v57 }
 0x352   :  { %v1816_v36 = vpop.permute.xlu1 %1216  ;;  %v597_v5 = vpop.permute.xlu0 %596 }
 0x353   :  { %v1219_v17 = vunpack.i.h.bf16 %v1816_v36  ;;  %v1218_v22 = vunpack.i.l.bf16 %v1816_v36 }
 0x354   :  { %1026 = vmatpush1.bf16.msra.mxu1 %v1025_v6 }
 0x355   :  { %v637_v47 = vsel %vm168_vm5, %v1218_v22, %v1219_v17 }
 0x356   :  { %v1828_v0 = vpop.permute.xlu1 %622  ;;  %v1027_v62 = vpack.c.bf16 %v637_v47, %v619_v11  ;;  %v583_v11 = vsel %vm111_vm3, %v1194_v52, %v1204_v63  ;;  %v1234_v47 = vunpack.i.h.bf16 %v1801_v58  ;;  %v565_v52 = vsel %vm92_vm2, %v1189_v20, %v1199_v59 }
 0x357   :  { %v638_v31 = vsel %vm168_vm5, %v1828_v0, %v1218_v22  ;;  %v527_v20 = vsel %vm54_vm0, %v1223_v44, %v1224_v4  ;;  %v603_v44 = vsel %vm130_vm4, %v597_v5, %v1807_v2 }
 0x358   :  { %v1029_v40 = vpack.c.bf16 %v638_v31, %v620_v29  ;;  %1028 = vmatprep.subr.bf16.mxu1 %v1027_v62  ;;  %v1037_v31 = vpack.c.bf16 %v583_v11, %v565_v52  ;;  %v563_v25 = vsel %vm92_vm2, %v1233_v60, %v1234_v47 }
 0x35a   :  { %v1227_v49 = vpop.permute.xlu1 %1226  ;;  %1030 = vmatpush1.bf16.msra.mxu1 %v1029_v40  ;;  %v656_v40 = vsel %vm187_vm7, %v1838_v46, %v643_v41 }
 0x35b   :  { %v1228_v21 = vunpack.i.l.bf16 %v1227_v49  ;;  %v1229_v51 = vunpack.i.h.bf16 %v1227_v49  ;;  %v1252_v49 = vpop.permute.xlu0 %1251 }
 0x35d   :  { %v546_v33 = vsel %vm73_vm1, %v1184_v34, %v1228_v21  ;;  %v544_v57 = vsel %vm73_vm1, %v1229_v51, %v1183_v37  ;;  %v545_v58 = vsel %vm73_vm1, %v1228_v21, %v1229_v51  ;;  %v526_v37 = vsel %vm54_vm0, %v1224_v4, %v1178_v35 }
 0x35e   :  { %v1237_v61 = vpop.permute.xlu1 %1236  ;;  %v1031_v7 = vpack.c.bf16 %v546_v33, %v528_v55  ;;  %v1047_v54 = vpack.c.bf16 %v544_v57, %v526_v37  ;;  %v1049_v32 = vpack.c.bf16 %v545_v58, %v527_v20  ;;  %v562_v35 = vsel %vm92_vm2, %v1234_v47, %v1198_v53 }
 0x35f   :  { %v1239_v6 = vunpack.i.h.bf16 %v1237_v61  ;;  %v1238_v22 = vunpack.i.l.bf16 %v1237_v61  ;;  %v1253_v53 = vunpack.i.l.bf16 %v1252_v49  ;;  %v1055_v33 = vpack.c.bf16 %v603_v44, %v1674_v28 }
 0x360   :  { %1032 = vmatprep.subr.bf16.mxu0 %v1031_v7 }
 0x361   :  { %1034 = vmatpush1.bf16.msra.mxu0 %v1033_v3  ;;  %v582_v45 = vsel %vm111_vm3, %v1204_v63, %v1238_v22  ;;  %v580_v8 = vsel %vm111_vm3, %v1239_v6, %v1203_v16  ;;  %v581_v50 = vsel %vm111_vm3, %v1238_v22, %v1239_v6  ;;  %v1254_v63 = vunpack.i.h.bf16 %v1252_v49 }
 0x362   :  { %v1874_v62 = vpop.permute.xlu1 %644  ;;  %v1035_v29 = vpack.c.bf16 %v582_v45, %v564_v24  ;;  %v1053_v51 = vpack.c.bf16 %v581_v50, %v563_v25  ;;  %v636_v27 = vsel %vm168_vm5, %v1219_v17, %v1253_v53 }
 0x363   :  { %v655_v34 = vsel %vm187_vm7, %v643_v41, %v1874_v62  ;;  %v1051_v41 = vpack.c.bf16 %v580_v8, %v562_v35  ;;  %v635_v36 = vsel %vm168_vm5, %v1253_v53, %v1254_v63 }
 0x364   :  { %677 = vmatprep.subr.mxu1 %v655_v34  ;;  %1036 = vmatprep.subr.bf16.mxu0 %v1035_v29 }
 0x365   :  { %678 = vmatpush1.msra.mxu1 %v656_v40  ;;  %1038 = vmatpush1.bf16.msra.mxu0 %v1037_v31 }
 0x366   :  { %v1242_v16 = vpop.permute.xlu1 %1241  ;;  %964 = vmatmul.mubr.msk.f32.vlgmr.msra.gmra.mrb[2].mxu1 %vm194_vm8, %v1882_v1  ;;  %1048 = vmatprep.subr.bf16.mxu1 %v1047_v54 }
 0x367   :  { %v1244_v21 = vunpack.i.h.bf16 %v1242_v16  ;;  %v1243_v13 = vunpack.i.l.bf16 %v1242_v16  ;;  %1050 = vmatpush1.bf16.msra.mxu1 %v1049_v32  ;;  %867 = vmatprep.mubr.f32.mxu1 %v1266_v10 }
 0x368   :  { %1052 = vmatprep.subr.bf16.mxu1 %v1051_v41 }
 0x369   :  { %v600_v55 = vsel %vm130_vm4, %v1209_v48, %v1243_v13  ;;  %v599_v2 = vsel %vm130_vm4, %v1243_v13, %v1244_v21  ;;  %v598_v10 = vsel %vm130_vm4, %v1244_v21, %v597_v5  ;;  %v633_v48 = vpop.permute.xlu0 %632 }
 0x36a   :  { %v1041_v59 = vpack.c.bf16 %v600_v55, %v1671_v23  ;;  %v1247_v60 = vpop.permute.xlu1 %1246  ;;  %v1039_v26 = vpack.c.bf16 %v599_v2, %v1690_v9  ;;  %v1057_v28 = vpack.c.bf16 %v598_v10, %v1693_v38  ;;  %v634_v5 = vsel %vm168_vm5, %v1254_v63, %v633_v48 }
 0x36b   :  { %v1249_v61 = vunpack.i.h.bf16 %v1247_v60  ;;  %v1248_v7 = vunpack.i.l.bf16 %v1247_v60  ;;  %1054 = vmatpush1.bf16.msra.mxu1 %v1053_v51  ;;  %v639_v38 = vsel %vm168_vm5, %v633_v48, %v1828_v0  ;;  %v875_v60 = vld [vmem:[%s2014_s7] sm:$0xff] }
 0x36c   :  { %1040 = vmatprep.subr.bf16.mxu0 %v1039_v26  ;;  %1056 = vmatprep.subr.bf16.mxu1 %v1055_v33 }
 0x36d   :  { %v618_v23 = vsel %vm149_vm6, %v1214_v15, %v1248_v7  ;;  %1042 = vmatpush1.bf16.msra.mxu0 %v1041_v59  ;;  %v617_v9 = vsel %vm149_vm6, %v1248_v7, %v1249_v61  ;;  %v649_v11 = vpop.permute.xlu0 %648 }
 0x36e   :  { %v1045_v3 = vpack.c.bf16 %v636_v27, %v618_v23  ;;  %v615_v4 = vpop.permute.xlu1 %614  ;;  %v1043_v17 = vpack.c.bf16 %v635_v36, %v617_v9  ;;  %v933_v9 = vld [vmem:[%s2015_s1] sm:$0xff] }
 0x36f   :  { %v616_v43 = vsel %vm149_vm6, %v1249_v61, %v615_v4  ;;  %v621_v15 = vsel %vm149_vm6, %v615_v4, %v1765_v42  ;;  %1058 = vmatpush1.bf16.msra.mxu1 %v1057_v28  ;;  %v934_v4 = vld [vmem:[%s2015_s1 + $0x8] sm:$0xff] }
 0x370   :  { %v1059_v6 = vpack.c.bf16 %v639_v38, %v621_v15  ;;  %v1061_v22 = vpack.c.bf16 %v634_v5, %v616_v43  ;;  %1044 = vmatprep.subr.bf16.mxu0 %v1043_v17  ;;  %v935_v17 = vld [vmem:[%s2015_s1 + $0x10] sm:$0xff]  ;;  %v936_v5 = vld [vmem:[%s2015_s1 + $0x18] sm:$0xff]  ;;  %v937_v43 = vld [vmem:[%s2015_s1 + $0x20] sm:$0xff] }
 0x371   :  { %1046 = vmatpush1.bf16.msra.mxu0 %v1045_v3  ;;  %v938_v15 = vld [vmem:[%s2015_s1 + $0x28] sm:$0xff] }
 0x372   :  { %v647_v47 = vpop.permute.xlu1 %646  ;;  %1060 = vmatprep.subr.bf16.mxu1 %v1059_v6 }
 0x373   :  { %v654_v24 = vsel %vm187_vm7, %v1874_v62, %v647_v47  ;;  %1062 = vmatpush1.bf16.msra.mxu1 %v1061_v22  ;;  %v653_v0 = vsel %vm187_vm7, %v647_v47, %v649_v11 }
 0x374   :  { %748 = vmatprep.subr.mxu0 %v653_v0 }
 0x375   :  { %749 = vmatpush1.msra.mxu0 %v654_v24 }
 0x376   :  { %v651_v45 = vpop.permute.xlu1 %650  ;;  %965 = vmatmul.mubr.msk.f32.vlgmr.msra.gmra.mrb[4].mxu0 %vm194_vm8, %v1882_v1 }
 0x377   :  { %v652_v42 = vsel %vm187_vm7, %v649_v11, %v651_v45  ;;  %v657_v57 = vsel %vm187_vm7, %v651_v45, %v1838_v46 }
 0x378   :  { %819 = vmatprep.subr.mxu1 %v657_v57 }
 0x379   :  { %820 = vmatpush1.msra.mxu1 %v652_v42 }
 0x37a   :  { %966 = vmatmul.mubr.msk.f32.vlgmr.msra.gmra.mrb[4].mxu1 %vm194_vm8, %v1882_v1 }
 0x439   :  { %v727_v52 = vpop.f32.mrb[2].mxu1 }
 0x43a   :  { %v876_v58 = vmul.f32 %v727_v52, %v1636_v56  ;;  %v729_v62 = vpop.f32.mrb[3].mxu1 }
 0x43b   :  { %v877_v29 = vmul.f32 %v729_v62, %v1638_v30 }
 0x43c   :  { %v889_v31 = vmul.f32 %v876_v58, %v727_v52 }
 0x43d   :  { %v882_v34 = vadd.f32 %v877_v29, %v876_v58  ;;  %v890_v37 = vmul.f32 %v877_v29, %v729_v62 }
 0x43f   :  { %v895_v8 = vadd.f32 %v890_v37, %v889_v31 }
 0x449   :  { %v798_v20 = vpop.f32.mrb[4].mxu0 }
 0x44a   :  { %v878_v40 = vmul.f32 %v798_v20, %v1642_v12  ;;  %v800_v14 = vpop.f32.mrb[5].mxu0 }
 0x44b   :  { %v879_v46 = vmul.f32 %v800_v14, %v1644_v18 }
 0x44c   :  { %v883_v54 = vadd.f32 %v882_v34, %v878_v40  ;;  %v891_v49 = vmul.f32 %v878_v40, %v798_v20 }
 0x44d   :  { %v892_v32 = vmul.f32 %v879_v46, %v800_v14  ;;  %v869_v1 = vpop.f32.mrb[4].mxu1 }
 0x44e   :  { %v896_v35 = vadd.f32 %v895_v8, %v891_v49  ;;  %v884_v50 = vadd.f32 %v883_v54, %v879_v46  ;;  %v880_v56 = vmul.f32 %v869_v1, %v1646_v19  ;;  %v871_v16 = vpop.f32.mrb[5].mxu1  ;;  %v874_v19 = vld [vmem:[%s2013_s6] sm:$0xff] }
 0x44f   :  { %v881_v30 = vmul.f32 %v871_v16, %v1651_v39 }
 0x450   :  { %v897_v41 = vadd.f32 %v896_v35, %v892_v32  ;;  %v893_v44 = vmul.f32 %v880_v56, %v869_v1  ;;  %v885_v21 = vadd.f32 %v884_v50, %v880_v56 }
 0x451   :  { %v894_v13 = vmul.f32 %v881_v30, %v871_v16 }
 0x452   :  { %v886_v25 = vadd.f32 %v885_v21, %v881_v30  ;;  %v898_v12 = vadd.f32 %v897_v41, %v893_v44 }
 0x454   :  { %887 = vadd.xlane.f32.xlu0 %v886_v25  ;;  %v899_v53 = vadd.f32 %v898_v12, %v894_v13 }
 0x456   :  { %900 = vadd.xlane.f32.xlu1 %v899_v53 }
 0x4e1   :  { %v888_v18 = vpop.xlane.xlu0 %887 }
 0x4e2   :  { %v902_v63 = vmul.f32 0.001953125, %v888_v18 }
 0x4e3   :  { %v901_v51 = vpop.xlane.xlu1 %900 }
 0x4e4   :  { %v904_v55 = vmul.f32 %v902_v63, %v902_v63  ;;  %v903_v2 = vmul.f32 0.001953125, %v901_v51 }
 0x4e6   :  { %v905_v33 = vsub.f32 %v903_v2, %v904_v55 }
 0x4e8   :  { %v906_v10 = vadd.f32 1e-05, %v905_v33 }
 0x4ea   :  { %1257 = vrsqrt.f32 %v906_v10 }
 0x4f4   :  { %v1258_v39 = vpop.eup %1257 }
 0x4f5   :  { %v908_v59 = vmul.f32 %v1258_v39, %v874_v19 }
 0x4f7   :  { %911 = vperm.xlu0 %1163, %v908_v59   ;;  %v920_v26 = vmul.f32 %v908_v59, %v902_v63 }
 0x4f9   :  { %v921_v61 = vsub.f32 %v875_v60, %v920_v26 }
 0x4fb   :  { %924 = vperm.xlu1 %1164, %v921_v61  }
 0x576   :  { %v912_v7 = vpop.permute.xlu0 %911 }
 0x577   :  { %v914_v27 = vmul.f32 %v912_v7, %v727_v52  ;;  %v915_v48 = vmul.f32 %v912_v7, %v729_v62  ;;  %v916_v28 = vmul.f32 %v912_v7, %v798_v20  ;;  %v917_v23 = vmul.f32 %v912_v7, %v800_v14 }
 0x578   :  { %v918_v36 = vmul.f32 %v912_v7, %v869_v1  ;;  %v919_v3 = vmul.f32 %v912_v7, %v871_v16 }
 0x57a   :  { %v925_v38 = vpop.permute.xlu1 %924 }
 0x57b   :  { %v927_v6 = vadd.f32 %v925_v38, %v914_v27  ;;  %v928_v22 = vadd.f32 %v925_v38, %v915_v48  ;;  %v929_v11 = vadd.f32 %v925_v38, %v916_v28  ;;  %v930_v47 = vadd.f32 %v925_v38, %v917_v23 }
 0x57c   :  { %v931_v24 = vadd.f32 %v925_v38, %v918_v36  ;;  %v932_v0 = vadd.f32 %v925_v38, %v919_v3 }
 0x57d   :  { %v939_v45 = vadd.f32 %v933_v9, %v927_v6  ;;  %v940_v42 = vadd.f32 %v934_v4, %v928_v22  ;;  %v941_v57 = vadd.f32 %v935_v17, %v929_v11  ;;  %v942_v52 = vadd.f32 %v936_v5, %v930_v47 }
 0x57e   :  { %v943_v58 = vadd.f32 %v937_v43, %v931_v24  ;;  %v944_v62 = vadd.f32 %v938_v15, %v932_v0 }
 0x57f   :  { %v945_v29 = vmax.f32 %v939_v45, 0.0  ;;  %v946_v31 = vmax.f32 %v940_v42, 0.0  ;;  %v947_v34 = vmax.f32 %v941_v57, 0.0  ;;  %v948_v37 = vmax.f32 %v942_v52, 0.0 }
 0x580   :  { %v949_v8 = vmax.f32 %v943_v58, 0.0  ;;  %v950_v20 = vmax.f32 %v944_v62, 0.0 }
 0x581   :  { %951 = vst [vmem:[%s2016_s9] sm:$0xff] %v945_v29  ;;  %952 = vst [vmem:[%s2016_s9 + $0x8] sm:$0xff] %v946_v31 }
 0x582   :  { %953 = vst [vmem:[%s2016_s9 + $0x10] sm:$0xff] %v947_v34  ;;  %954 = vst [vmem:[%s2016_s9 + $0x18] sm:$0xff] %v948_v37 }
 0x583   :  { %955 = vst [vmem:[%s2016_s9 + $0x20] sm:$0xff] %v949_v8  ;;  %956 = vst [vmem:[%s2016_s9 + $0x28] sm:$0xff] %v950_v20 }

</bundles_post_ra>
